<compile_context>
chip_gen: v6e
topology: v6e:2x2x1
jax: 0.10.0
libtpu: 0.0.40
codegen_flags: <defaults>
</compile_context>

<pallas_src>
import functools

import numpy as np
import jax
import jax.numpy as jnp
from jax.experimental import pallas as pl
from jax.experimental.pallas import tpu as pltpu


# ---------------------------------------------------------------------------
# Kernels
# ---------------------------------------------------------------------------
def _single_step_kernel(x_ref, w1t_ref, gamma_ref, beta_ref, w2t_ref, o_ref,
                        *, inv_n, eps):
    """Fast path: whole problem resident in VMEM, one grid step."""
    # Linear 1 (no bias): bf16 operands, f32 accumulator (native MXU path).
    h = jnp.dot(x_ref[...], w1t_ref[...], preferred_element_type=jnp.float32)
    # Train-mode BatchNorm1d statistics (biased variance), single sweep.
    s = jnp.sum(h, axis=0, keepdims=True)
    ss = jnp.sum(h * h, axis=0, keepdims=True)
    mean = s * inv_n
    var = jnp.maximum(ss * inv_n - mean * mean, 0.0)
    scale = gamma_ref[...] * jax.lax.rsqrt(var + eps)
    shift = beta_ref[...] - mean * scale
    # Folded BN + ReLU, then Linear 2 (bf16 LHS, f32 acc).
    h_act = jnp.maximum(h * scale + shift, 0.0)
    out = jnp.dot(h_act.astype(w2t_ref.dtype), w2t_ref[...],
                  preferred_element_type=jnp.float32)
    o_ref[...] = out.astype(o_ref.dtype)


def _tiled_kernel(x_ref, w1t_ref, gamma_ref, beta_ref, w2t_ref, o_ref,
                  sum_ref, sumsq_ref, scale_ref, shift_ref, h_stash_ref,
                  *, inv_n, eps, block_b, use_h_stash):
    """Two-phase grid over (phase, b-tile):
         phase 0: h_tile = x_tile @ W1^T, accumulate per-feature sum/sumsq,
                  optionally stash h_tile (bf16) in persistent VMEM scratch.
         phase 1: finalize folded BN scale/shift once, then per tile apply
                  BN + ReLU to the stashed (or recomputed) h and run matmul 2.
    """
    phase = pl.program_id(0)
    b = pl.program_id(1)

    @pl.when((phase == 0) & (b == 0))
    def _init_stats():
        sum_ref[...] = jnp.zeros_like(sum_ref)
        sumsq_ref[...] = jnp.zeros_like(sumsq_ref)

    @pl.when(phase == 0)
    def _matmul1_and_stats():
        h = jnp.dot(x_ref[...], w1t_ref[...], preferred_element_type=jnp.float32)
        sum_ref[...] += jnp.sum(h, axis=0, keepdims=True)
        sumsq_ref[...] += jnp.sum(h * h, axis=0, keepdims=True)
        if use_h_stash:
            row0 = pl.multiple_of(b * block_b, block_b)
            h_stash_ref[pl.ds(row0, block_b), :] = h.astype(h_stash_ref.dtype)

    @pl.when((phase == 1) & (b == 0))
    def _finalize_stats():
        # Fold BatchNorm (train-mode biased variance) into one scale/shift.
        mean = sum_ref[...] * inv_n
        var = jnp.maximum(sumsq_ref[...] * inv_n - mean * mean, 0.0)
        scale = gamma_ref[...] * jax.lax.rsqrt(var + eps)
        scale_ref[...] = scale
        shift_ref[...] = beta_ref[...] - mean * scale

    @pl.when(phase == 1)
    def _normalize_and_project():
        if use_h_stash:
            row0 = pl.multiple_of(b * block_b, block_b)
            h = h_stash_ref[pl.ds(row0, block_b), :].astype(jnp.float32)
        else:
            # Fallback when the stash would not fit VMEM: recompute matmul 1.
            h = jnp.dot(x_ref[...], w1t_ref[...],
                        preferred_element_type=jnp.float32)
        # Folded BN + ReLU: 1 mul + 1 add + 1 max per element.
        h_act = jnp.maximum(h * scale_ref[...] + shift_ref[...], 0.0)
        out = jnp.dot(h_act.astype(w2t_ref.dtype), w2t_ref[...],
                      preferred_element_type=jnp.float32)
        o_ref[...] = out.astype(o_ref.dtype)


# ---------------------------------------------------------------------------
# Host-side wrappers
# ---------------------------------------------------------------------------
def prepare_params(w1, gamma, beta, w2, compute_dtype=jnp.bfloat16):
    """Hoisted, call-once parameter prep: transpose PyTorch-layout (out,in) weights
    to (in,out) and cast to the MXU compute dtype; keep BN params in f32."""
    return dict(
        w1t=jnp.asarray(w1).T.astype(compute_dtype),      # (D, D)
        w2t=jnp.asarray(w2).T.astype(compute_dtype),      # (D, O)
        gamma=jnp.asarray(gamma).reshape(1, -1).astype(jnp.float32),
        beta=jnp.asarray(beta).reshape(1, -1).astype(jnp.float32),
    )


def _vmem_limit_bytes():
    """Derive a per-generation VMEM limit (v7x has 64 MiB, v5e/v6e 128 MiB)."""
    try:
        cap = int(pltpu.get_tpu_info().vmem_capacity_bytes)
    except Exception:
        cap = 64 * 1024 * 1024  # conservative: assume v7x physical VMEM
    return max(32 * 1024 * 1024, min(cap * 3 // 4, 96 * 1024 * 1024))


def _pick_block_b(B, vmem_limit):
    """Bigger B tiles amortize per-grid-step overhead; prefer multiples of 128
    for MXU M-streaming; cap lower when VMEM is tight (v7x)."""
    cap = 1024 if vmem_limit >= 64 * 1024 * 1024 else 512
    for cand in (cap, cap // 2, cap // 4, 256, 128, 64, 32, 16):
        if cand <= B and B % cand == 0:
            return cand
    return B


def projector_forward(feature, params, *, block_b=None, out_dtype=jnp.float32,
                      eps=1e-5, force_tiled=False):
    """feature: (B, D) in the compute dtype (e.g. bf16); params from prepare_params."""
    B, D = feature.shape
    w1t, w2t = params["w1t"], params["w2t"]
    gamma, beta = params["gamma"], params["beta"]
    O = w2t.shape[1]
    vmem_limit = _vmem_limit_bytes()
    out_itemsize = np.dtype(out_dtype).itemsize

    # Rough VMEM need of the single-step fast path (x + out double-buffered,
    # resident weights double-buffered, f32 h + h_act temporaries).
    single_bytes = (2 * (B * D * feature.dtype.itemsize + B * O * out_itemsize)
                    + 2 * (D * D + D * O) * w1t.dtype.itemsize
                    + 2 * B * D * 4)
    use_single = (not force_tiled) and single_bytes <= vmem_limit // 2

    if use_single:
        kernel = functools.partial(_single_step_kernel, inv_n=1.0 / B, eps=eps)
        return pl.pallas_call(
            kernel,
            out_shape=jax.ShapeDtypeStruct((B, O), out_dtype),
            grid_spec=pltpu.PrefetchScalarGridSpec(
                num_scalar_prefetch=0,
                grid=(1,),
                in_specs=[
                    pl.BlockSpec((B, D), lambda i: (0, 0)),   # x (whole batch)
                    pl.BlockSpec((D, D), lambda i: (0, 0)),   # W1^T
                    pl.BlockSpec((1, D), lambda i: (0, 0)),   # gamma
                    pl.BlockSpec((1, D), lambda i: (0, 0)),   # beta
                    pl.BlockSpec((D, O), lambda i: (0, 0)),   # W2^T
                ],
                out_specs=pl.BlockSpec((B, O), lambda i: (0, 0)),
            ),
            compiler_params=pltpu.CompilerParams(
                dimension_semantics=("arbitrary",),
                vmem_limit_bytes=vmem_limit),
        )(feature, w1t, gamma, beta, w2t)

    # ------------------ tiled two-phase path (large B) ------------------
    if block_b is None:
        block_b = _pick_block_b(B, vmem_limit)
    assert B % block_b == 0, "batch must be divisible by block_b"
    assert block_b == B or block_b % 16 == 0, \
        "bf16 B tile must be a multiple of 16 (two rows pack per sublane)"
    nb = B // block_b

    # Stash h (bf16) across phases when it fits a quarter of the VMEM budget;
    # otherwise fall back to recomputing x @ W1^T in phase 1.
    use_h_stash = (B * D * 2) <= vmem_limit // 4
    h_stash_shape = (B, D) if use_h_stash else (8, 128)   # (8,128) = unused dummy

    kernel = functools.partial(_tiled_kernel, inv_n=1.0 / B, eps=eps,
                               block_b=block_b, use_h_stash=use_h_stash)

    if use_h_stash:
        # Phase 1 never reads x: park its block index at 0 so the pipeline skips
        # re-fetching x after the first phase-1 step (x read from HBM ~once).
        x_map = lambda p, b: ((1 - p) * b, 0)
    else:
        x_map = lambda p, b: (b, 0)

    return pl.pallas_call(
        kernel,
        out_shape=jax.ShapeDtypeStruct((B, O), out_dtype),
        grid_spec=pltpu.PrefetchScalarGridSpec(
            num_scalar_prefetch=0,
            grid=(2, nb),                                        # (phase, b-tile)
            in_specs=[
                pl.BlockSpec((block_b, D), x_map),                # x tile
                pl.BlockSpec((D, D), lambda p, b: (0, 0)),        # W1^T resident
                pl.BlockSpec((1, D), lambda p, b: (0, 0)),        # gamma resident
                pl.BlockSpec((1, D), lambda p, b: (0, 0)),        # beta resident
                pl.BlockSpec((D, O), lambda p, b: (0, 0)),        # W2^T resident
            ],
            # Phase 0 never writes o_ref and keeps the output block index at 0, so
            # no garbage writeback ever reaches HBM; phase 1 walks the real tiles.
            # NOTE: this relies on the (phase, b) iteration order and on the b axis
            # staying "arbitrary" (never megacore-sharded).
            out_specs=pl.BlockSpec((block_b, O), lambda p, b: (p * b, 0)),
            scratch_shapes=[
                pltpu.VMEM((1, D), jnp.float32),        # per-feature sum
                pltpu.VMEM((1, D), jnp.float32),        # per-feature sum of squares
                pltpu.VMEM((1, D), jnp.float32),        # folded BN scale
                pltpu.VMEM((1, D), jnp.float32),        # folded BN shift
                pltpu.VMEM(h_stash_shape, jnp.bfloat16),  # persistent h stash
            ],
        ),
        compiler_params=pltpu.CompilerParams(
            # Phase axis is sequential; B axis shares the stats scratch + h stash,
            # so it must stay "arbitrary" too.
            dimension_semantics=("arbitrary", "arbitrary"),
            vmem_limit_bytes=vmem_limit),
    )(feature, w1t, gamma, beta, w2t)


def reference_forward(feature, params, eps=1e-5):
    """Pure-JAX reference with the same (bf16-in, f32-acc) matmul semantics."""
    w1t, w2t = params["w1t"], params["w2t"]
    gamma, beta = params["gamma"], params["beta"]
    h = jnp.dot(feature, w1t, preferred_element_type=jnp.float32)
    mean = jnp.mean(h, axis=0, keepdims=True)
    var = jnp.mean((h - mean) ** 2, axis=0, keepdims=True)
    h = (h - mean) * jax.lax.rsqrt(var + eps) * gamma + beta
    h = jnp.maximum(h, 0.0).astype(w2t.dtype)
    return jnp.dot(h, w2t, preferred_element_type=jnp.float32)


if __name__ == "__main__":
    # Module defaults: input_dim = output_dim = 128.
    D, O = 128, 128

    key = jax.random.PRNGKey(0)
    k_x1, k_x2, k_w1, k_w2 = jax.random.split(key, 4)

    # Synthetic parameters (nn.Linear weight layout is (out, in)).
    w1 = jax.random.normal(k_w1, (D, D), dtype=jnp.float32) * (1.0 / jnp.sqrt(D))
    w2 = jax.random.normal(k_w2, (O, D), dtype=jnp.float32) * (1.0 / jnp.sqrt(D))
    gamma = jnp.ones((D,), dtype=jnp.float32)   # BatchNorm1d weight init
    beta = jnp.zeros((D,), dtype=jnp.float32)   # BatchNorm1d bias init
    params = prepare_params(w1, gamma, beta, w2, compute_dtype=jnp.bfloat16)

    # --- Test 1: demo shape (B=256) takes the single-step fast path. ---
    B1 = 256
    x1 = jax.random.normal(k_x1, (B1, D), dtype=jnp.float32).astype(jnp.bfloat16)
    out1 = jax.block_until_ready(projector_forward(x1, params))
    ref1 = reference_forward(x1, params)
    assert out1.shape == (B1, O)
    assert jnp.allclose(out1, ref1, atol=5e-2, rtol=2e-2), (
        "fast-path mismatch: max abs err = "
        f"{float(jnp.max(jnp.abs(out1 - ref1)))}")

    # --- Test 2: larger batch forced through the tiled two-phase (h-stash) path. ---
    B2 = 512
    x2 = jax.random.normal(k_x2, (B2, D), dtype=jnp.float32).astype(jnp.bfloat16)
    out2 = jax.block_until_ready(
        projector_forward(x2, params, block_b=128, force_tiled=True))
    ref2 = reference_forward(x2, params)
    assert out2.shape == (B2, O)
    assert jnp.allclose(out2, ref2, atol=5e-2, rtol=2e-2), (
        "tiled-path mismatch: max abs err = "
        f"{float(jnp.max(jnp.abs(out2 - ref2)))}")

    print("KERNEL_OK")
</pallas_src>

<mosaic_0001>
module attributes {stable_mosaic.version = 11 : i64} {
  func.func @_single_step_kernel(%arg0: i32, %arg1: memref<256x128xbf16, #tpu.memory_space<vmem>>, %arg2: memref<128x128xbf16, #tpu.memory_space<vmem>>, %arg3: memref<1x128xf32, #tpu.memory_space<vmem>>, %arg4: memref<1x128xf32, #tpu.memory_space<vmem>>, %arg5: memref<128x128xbf16, #tpu.memory_space<vmem>>, %arg6: memref<256x128xf32, #tpu.memory_space<vmem>>) attributes {dimension_semantics = [#tpu.dimension_semantics<arbitrary>], iteration_bounds = array<i64: 1>, scalar_prefetch = 0 : i64, scratch_operands = 0 : i64, tpu.core_type = #tpu.core_type<tc>, window_params = [{pipeline_mode = #tpu.pipeline_mode<synchronous>, transform_indices = @transform_0, window_bounds = array<i64: 256, 128>}, {pipeline_mode = #tpu.pipeline_mode<synchronous>, transform_indices = @transform_1, window_bounds = array<i64: 128, 128>}, {pipeline_mode = #tpu.pipeline_mode<synchronous>, transform_indices = @transform_2, window_bounds = array<i64: 1, 128>}, {pipeline_mode = #tpu.pipeline_mode<synchronous>, transform_indices = @transform_3, window_bounds = array<i64: 1, 128>}, {pipeline_mode = #tpu.pipeline_mode<synchronous>, transform_indices = @transform_4, window_bounds = array<i64: 128, 128>}, {pipeline_mode = #tpu.pipeline_mode<synchronous>, transform_indices = @transform_5, window_bounds = array<i64: 256, 128>}]} {
    %c0 = arith.constant 0 : index
    %c0_0 = arith.constant 0 : index
    %0 = vector.load %arg1[%c0, %c0_0] : memref<256x128xbf16, #tpu.memory_space<vmem>>, vector<256x128xbf16>
    %c0_1 = arith.constant 0 : index
    %c0_2 = arith.constant 0 : index
    %1 = vector.load %arg2[%c0_1, %c0_2] : memref<128x128xbf16, #tpu.memory_space<vmem>>, vector<128x128xbf16>
    %cst = arith.constant dense<0.000000e+00> : vector<256x128xf32>
    %2 = tpu.matmul %0, %1, %cst {dimension_numbers = #tpu.dot_dimension_numbers<[1], [0], [0], [1], [0, 0, 1, 1], [], []>} : vector<256x128xbf16>, vector<128x128xbf16>, vector<256x128xf32> -> vector<256x128xf32>
    %cst_3 = arith.constant dense<0.000000e+00> : vector<128xf32>
    %3 = vector.multi_reduction <add>, %2, %cst_3 [0] : vector<256x128xf32> to vector<128xf32>
    %4 = vector.shape_cast %3 : vector<128xf32> to vector<1x128xf32>
    %5 = arith.mulf %2, %2 : vector<256x128xf32>
    %cst_4 = arith.constant dense<0.000000e+00> : vector<128xf32>
    %6 = vector.multi_reduction <add>, %5, %cst_4 [0] : vector<256x128xf32> to vector<128xf32>
    %7 = vector.shape_cast %6 : vector<128xf32> to vector<1x128xf32>
    %cst_5 = arith.constant 3.906250e-03 : f32
    %8 = vector.broadcast %cst_5 : f32 to vector<1x128xf32>
    %9 = arith.mulf %4, %8 : vector<1x128xf32>
    %cst_6 = arith.constant 3.906250e-03 : f32
    %10 = vector.broadcast %cst_6 : f32 to vector<1x128xf32>
    %11 = arith.mulf %7, %10 : vector<1x128xf32>
    %12 = arith.mulf %9, %9 : vector<1x128xf32>
    %13 = arith.subf %11, %12 : vector<1x128xf32>
    %cst_7 = arith.constant 0.000000e+00 : f32
    %14 = vector.broadcast %cst_7 : f32 to vector<1x128xf32>
    %15 = arith.maximumf %13, %14 : vector<1x128xf32>
    %c0_8 = arith.constant 0 : index
    %c0_9 = arith.constant 0 : index
    %16 = vector.load %arg3[%c0_8, %c0_9] : memref<1x128xf32, #tpu.memory_space<vmem>>, vector<1x128xf32>
    %cst_10 = arith.constant 9.99999974E-6 : f32
    %17 = vector.broadcast %cst_10 : f32 to vector<1x128xf32>
    %18 = arith.addf %15, %17 : vector<1x128xf32>
    %19 = math.rsqrt %18 : vector<1x128xf32>
    %20 = arith.mulf %16, %19 : vector<1x128xf32>
    %c0_11 = arith.constant 0 : index
    %c0_12 = arith.constant 0 : index
    %21 = vector.load %arg4[%c0_11, %c0_12] : memref<1x128xf32, #tpu.memory_space<vmem>>, vector<1x128xf32>
    %22 = arith.mulf %9, %20 : vector<1x128xf32>
    %23 = arith.subf %21, %22 : vector<1x128xf32>
    %24 = vector.broadcast %20 : vector<1x128xf32> to vector<256x128xf32>
    %25 = arith.mulf %2, %24 : vector<256x128xf32>
    %26 = vector.broadcast %23 : vector<1x128xf32> to vector<256x128xf32>
    %27 = arith.addf %25, %26 : vector<256x128xf32>
    %cst_13 = arith.constant 0.000000e+00 : f32
    %28 = vector.broadcast %cst_13 : f32 to vector<256x128xf32>
    %29 = arith.maximumf %27, %28 : vector<256x128xf32>
    %30 = arith.truncf %29 : vector<256x128xf32> to vector<256x128xbf16>
    %c0_14 = arith.constant 0 : index
    %c0_15 = arith.constant 0 : index
    %31 = vector.load %arg5[%c0_14, %c0_15] : memref<128x128xbf16, #tpu.memory_space<vmem>>, vector<128x128xbf16>
    %cst_16 = arith.constant dense<0.000000e+00> : vector<256x128xf32>
    %32 = tpu.matmul %30, %31, %cst_16 {dimension_numbers = #tpu.dot_dimension_numbers<[1], [0], [0], [1], [0, 0, 1, 1], [], []>} : vector<256x128xbf16>, vector<128x128xbf16>, vector<256x128xf32> -> vector<256x128xf32>
    %c0_17 = arith.constant 0 : index
    %c0_18 = arith.constant 0 : index
    %33 = vector.load %arg6[%c0_17, %c0_18] : memref<256x128xf32, #tpu.memory_space<vmem>>, vector<256x128xf32>
    tpu.vector_store %arg6[%c0_17, %c0_18], %32 {strides = array<i32>} : memref<256x128xf32, #tpu.memory_space<vmem>>, vector<256x128xf32>,
    return
  }
  func.func @transform_0(%arg0: i32) -> (i32, i32) {
    %c0_i32 = arith.constant 0 : i32
    %c0_i32_0 = arith.constant 0 : i32
    %c0_i32_1 = arith.constant 0 : i32
    return %c0_i32, %c0_i32_0 : i32, i32
  }
  func.func @transform_1(%arg0: i32) -> (i32, i32) {
    %c0_i32 = arith.constant 0 : i32
    %c0_i32_0 = arith.constant 0 : i32
    %c0_i32_1 = arith.constant 0 : i32
    return %c0_i32, %c0_i32_0 : i32, i32
  }
  func.func @transform_2(%arg0: i32) -> (i32, i32) {
    %c0_i32 = arith.constant 0 : i32
    %c0_i32_0 = arith.constant 0 : i32
    %c0_i32_1 = arith.constant 0 : i32
    return %c0_i32, %c0_i32_0 : i32, i32
  }
  func.func @transform_3(%arg0: i32) -> (i32, i32) {
    %c0_i32 = arith.constant 0 : i32
    %c0_i32_0 = arith.constant 0 : i32
    %c0_i32_1 = arith.constant 0 : i32
    return %c0_i32, %c0_i32_0 : i32, i32
  }
  func.func @transform_4(%arg0: i32) -> (i32, i32) {
    %c0_i32 = arith.constant 0 : i32
    %c0_i32_0 = arith.constant 0 : i32
    %c0_i32_1 = arith.constant 0 : i32
    return %c0_i32, %c0_i32_0 : i32, i32
  }
  func.func @transform_5(%arg0: i32) -> (i32, i32) {
    %c0_i32 = arith.constant 0 : i32
    %c0_i32_0 = arith.constant 0 : i32
    %c0_i32_1 = arith.constant 0 : i32
    return %c0_i32, %c0_i32_0 : i32, i32
  }
}

</mosaic_0001>

<bundles_post_ra>
// kernel: tpu_custom_call.1
= control target key start
LH: loop header
LB: loop body
LE: loop exit
PB: predicated region body
PF: predicated region fallthrough
CT: control target
= control target key end

     0   :  { %10 = vsyncpa [#allocation3], 0  ;;  %s1553_s0 = inlined_call_operand.hbm [shape: bf16[256,128], index: 0, kind: input, shape index: {}]   ;;  %s1554_s1 = inlined_call_operand.hbm [shape: bf16[128,128], index: 1, kind: input, shape index: {}]   ;;  %s1555_s2 = inlined_call_operand.vmem [shape: f32[1,128], index: 2, kind: input, shape index: {}]   ;;  %s1556_s3 = inlined_call_operand.vmem [shape: f32[1,128], index: 3, kind: input, shape index: {}]   ;;  %s1557_s4 = inlined_call_operand.hbm [shape: bf16[128,128], index: 4, kind: input, shape index: {}]   ;;  %s1558_s5 = inlined_call_operand.hbm [shape: f32[256,128], index: 5, kind: output, shape index: {}]  }
   0x1   :  { %11 = vsyncpa [#allocation6], 0 }
   0x2   :  { %12 = vsyncpa [#allocation4], 0  ;;  %s1237_s18 = smov [#allocation5]   ;;  %s1238_s20 = smov [#allocation2]  }
   0x3   :  { %s30_s19 = sshll.u32 %s1237_s18, 4  ;;  %s18_s21 = sshll.u32 %s1238_s20, 4  ;;  %s31_s19 = int_to_ptr.vmem [resolvable:$true] %s30_s19  ;;  %s19_s21 = int_to_ptr.vmem [resolvable:$true] %s18_s21 }
   0x4   :  { %s1159_s22 = scalar_lea.vmem %s31_s19, 1024  ;;  %p1164_p1 = scmp.lt.s32.totalorder %s31_s19, %s31_s19 }
   0x5   :  { %p1160_p0 = scmp.ne.s32.totalorder %s31_s19, %s1159_s22  ;;  %p1165_p2 = scmp.lt.s32.totalorder %s1159_s22, %s1159_s22 }
   0x7   :  { %p1166_p3 = por %p1165_p2, %p1164_p1 }
   0x9   :  { %p1167_p4 = pnand %p1166_p3, %p1160_p0 }
   0xb   :  { %1170 = shalt.err (!%p1167_p4)
}
   0xc   :  { %s1239_s23 = smov 64   ;;  %s1240_s24 = smov 4  }
   0xd   :  { %36 = dma.hbm_to_vmem [thread:$0]  %s1554_s1, 1024, %s31_s19, [#allocation6], %s1239_s23, %s1239_s23, %s1240_s24  }
   0xe   :  { %s1179_s27 = scalar_lea.vmem %s19_s21, 2048  ;;  %p1184_p6 = scmp.lt.s32.totalorder %s19_s21, %s19_s21 }
   0xf   :  { %p1180_p5 = scmp.ne.s32.totalorder %s19_s21, %s1179_s27  ;;  %p1185_p7 = scmp.lt.s32.totalorder %s1179_s27, %s1179_s27 }
  0x11   :  { %p1186_p8 = por %p1185_p7, %p1184_p6 }
  0x13   :  { %p1187_p9 = pnand %p1186_p8, %p1180_p5 }
  0x15   :  { %1190 = shalt.err (!%p1187_p9)
}
  0x16   :  { %24 = dma.hbm_to_vmem [thread:$0]  %s1553_s0, 2048, %s19_s21, [#allocation3], %s1239_s23, %s1239_s23, %s1240_s24  }
  0x17   :  { %s1241_s30 = smov [#allocation7]  }
  0x18   :  { %s46_s6 = sshll.u32 %s1241_s30, 4  ;;  %s47_s6 = int_to_ptr.vmem [resolvable:$true] %s46_s6 }
  0x19   :  { %s1199_s7 = scalar_lea.vmem %s47_s6, 1024  ;;  %p1204_p11 = scmp.lt.s32.totalorder %s47_s6, %s47_s6 }
  0x1a   :  { %p1200_p10 = scmp.ne.s32.totalorder %s47_s6, %s1199_s7  ;;  %p1205_p12 = scmp.lt.s32.totalorder %s1199_s7, %s1199_s7 }
  0x1c   :  { %p1206_p13 = por %p1205_p12, %p1204_p11 }
  0x1e   :  { %p1207_p0 = pnand %p1206_p13, %p1200_p10 }
  0x20   :  { %1210 = shalt.err (!%p1207_p0)
}
  0x21   :  { %52 = dma.hbm_to_vmem [thread:$0]  %s1557_s4, 1024, %s47_s6, [#allocation6], %s1239_s23, %s1239_s23, %s1240_s24  }
  0x22   :  { %1231 = dma.done.wait [#allocation3], 2048  }
  0x23   :  { %1232 = vsyncadd [#allocation3], 4294965248 }
  0x24   :  { %1233 = dma.done.wait [#allocation6], 2048  }
  0x25   :  { %1234 = vsyncadd [#allocation6], 4294965248  ;;  %v1117_v0 = vld [vmem:[#allocation5 + $0x38] sm:$0xff]   ;;  %v1118_v1 = vld [vmem:[#allocation5 + $0x30] sm:$0xff]  }
  0x26   :  { %1013 = vmatprep.subr.bf16.mxu0 %v1117_v0  ;;  %v1119_v2 = vld [vmem:[#allocation5 + $0x28] sm:$0xff]   ;;  %v1120_v3 = vld [vmem:[#allocation5 + $0x20] sm:$0xff]   ;;  %v1121_v5 = vld [vmem:[#allocation5 + $0x18] sm:$0xff]  }
  0x27   :  { %1014 = vmatpush3.bf16.msra.mxu0 %v1117_v0  ;;  %v1125_v4 = vld [vmem:[#allocation2] sm:$0xff]   ;;  %v1122_v6 = vld [vmem:[#allocation5 + $0x10] sm:$0xff]   ;;  %v1123_v7 = vld [vmem:[#allocation5 + $0x8] sm:$0xff]  }
  0x28   :  { %1015 = vmatprep.subr.bf16.mxu0 %v1118_v1  ;;  %1029 = vmatprep.mubr.bf16.mxu0 %v1125_v4  ;;  %v1124_v8 = vld [vmem:[#allocation5] sm:$0xff]   ;;  %v1126_v9 = vld [vmem:[#allocation2 + $0x8] sm:$0xff]   ;;  %v1127_v10 = vld [vmem:[#allocation2 + $0x10] sm:$0xff]  }
  0x29   :  { %v1128_v11 = vld [vmem:[#allocation2 + $0x18] sm:$0xff]   ;;  %v1129_v12 = vld [vmem:[#allocation2 + $0x20] sm:$0xff]   ;;  %v1130_v13 = vld [vmem:[#allocation2 + $0x28] sm:$0xff]  }
  0x2a   :  { %v1131_v14 = vld [vmem:[#allocation2 + $0x30] sm:$0xff]   ;;  %v1132_v15 = vld [vmem:[#allocation2 + $0x38] sm:$0xff]   ;;  %v1133_v16 = vld [vmem:[#allocation2 + $0x40] sm:$0xff]  }
  0x2b   :  { %1016 = vmatpush3.bf16.msra.mxu0 %v1118_v1  ;;  %v1134_v17 = vld [vmem:[#allocation2 + $0x48] sm:$0xff]   ;;  %v1135_v18 = vld [vmem:[#allocation2 + $0x50] sm:$0xff]   ;;  %v1136_v19 = vld [vmem:[#allocation2 + $0x58] sm:$0xff]  }
  0x2c   :  { %1017 = vmatprep.subr.bf16.mxu0 %v1119_v2  ;;  %v1137_v20 = vld [vmem:[#allocation2 + $0x60] sm:$0xff]   ;;  %v1138_v21 = vld [vmem:[#allocation2 + $0x68] sm:$0xff]   ;;  %v1139_v22 = vld [vmem:[#allocation2 + $0x70] sm:$0xff]  }
  0x2d   :  { %v1140_v23 = vld [vmem:[#allocation2 + $0x78] sm:$0xff]   ;;  %v1142_v25 = vld [vmem:[#allocation7 + $0x30] sm:$0xff]   ;;  %v1143_v26 = vld [vmem:[#allocation7 + $0x28] sm:$0xff]  }
  0x2e   :  { %v1141_v24 = vld [vmem:[#allocation7 + $0x38] sm:$0xff]   ;;  %v1144_v27 = vld [vmem:[#allocation7 + $0x20] sm:$0xff]   ;;  %v1146_v29 = vld [vmem:[#allocation7 + $0x10] sm:$0xff]  }
  0x2f   :  { %1018 = vmatpush3.bf16.msra.mxu0 %v1119_v2  ;;  %1061 = vmatprep.subr.bf16.mxu1 %v1141_v24  ;;  %v1145_v28 = vld [vmem:[#allocation7 + $0x18] sm:$0xff]   ;;  %v1147_v30 = vld [vmem:[#allocation7 + $0x8] sm:$0xff]   ;;  %v1148_v31 = vld [vmem:[#allocation7] sm:$0xff]  }
  0x30   :  { %1019 = vmatprep.subr.bf16.mxu0 %v1120_v3  ;;  %1062 = vmatpush3.bf16.msra.mxu1 %v1141_v24 }
  0x31   :  { %1063 = vmatprep.subr.bf16.mxu1 %v1142_v25 }
  0x33   :  { %1020 = vmatpush3.bf16.msra.mxu0 %v1120_v3 }
  0x34   :  { %1021 = vmatprep.subr.bf16.mxu0 %v1121_v5  ;;  %1064 = vmatpush3.bf16.msra.mxu1 %v1142_v25 }
  0x35   :  { %1065 = vmatprep.subr.bf16.mxu1 %v1143_v26 }
  0x37   :  { %1022 = vmatpush3.bf16.msra.mxu0 %v1121_v5 }
  0x38   :  { %1023 = vmatprep.subr.bf16.mxu0 %v1122_v6  ;;  %1066 = vmatpush3.bf16.msra.mxu1 %v1143_v26 }
  0x39   :  { %1067 = vmatprep.subr.bf16.mxu1 %v1144_v27 }
  0x3b   :  { %1024 = vmatpush3.bf16.msra.mxu0 %v1122_v6 }
  0x3c   :  { %1025 = vmatprep.subr.bf16.mxu0 %v1123_v7  ;;  %1068 = vmatpush3.bf16.msra.mxu1 %v1144_v27 }
  0x3d   :  { %1069 = vmatprep.subr.bf16.mxu1 %v1145_v28 }
  0x3f   :  { %1026 = vmatpush3.bf16.msra.mxu0 %v1123_v7 }
  0x40   :  { %1027 = vmatprep.subr.bf16.mxu0 %v1124_v8  ;;  %1070 = vmatpush3.bf16.msra.mxu1 %v1145_v28 }
  0x41   :  { %1071 = vmatprep.subr.bf16.mxu1 %v1146_v29 }
  0x43   :  { %1028 = vmatpush3.bf16.msra.mxu0 %v1124_v8 }
  0x44   :  { %1072 = vmatpush3.bf16.msra.mxu1 %v1146_v29 }
  0x45   :  { %1073 = vmatprep.subr.bf16.mxu1 %v1147_v30 }
  0x46   :  { %1030 = vmatmul.mubr.bf16.vlgmr.msra.gmra.mxu0 %v1126_v9 }
  0x47   :  { %1033 = vmatprep.mubr.bf16.mxu0 %v1127_v10 }
  0x48   :  { %1074 = vmatpush3.bf16.msra.mxu1 %v1147_v30 }
  0x49   :  { %1075 = vmatprep.subr.bf16.mxu1 %v1148_v31 }
  0x4c   :  { %1076 = vmatpush3.bf16.msra.mxu1 %v1148_v31 }
  0x4e   :  { %1034 = vmatmul.mubr.bf16.gmra.mxu0 %v1128_v11 }
  0x4f   :  { %1037 = vmatprep.mubr.bf16.mxu0 %v1129_v12 }
  0x56   :  { %1038 = vmatmul.mubr.bf16.gmra.mxu0 %v1130_v13 }
  0x57   :  { %1041 = vmatprep.mubr.bf16.mxu0 %v1131_v14 }
  0x5e   :  { %1042 = vmatmul.mubr.bf16.gmra.mxu0 %v1132_v15 }
  0x5f   :  { %1045 = vmatprep.mubr.bf16.mxu0 %v1133_v16 }
  0x66   :  { %1046 = vmatmul.mubr.bf16.gmra.mxu0 %v1134_v17 }
  0x67   :  { %1049 = vmatprep.mubr.bf16.mxu0 %v1135_v18 }
  0x6e   :  { %1050 = vmatmul.mubr.bf16.gmra.mxu0 %v1136_v19 }
  0x6f   :  { %1053 = vmatprep.mubr.bf16.mxu0 %v1137_v20 }
  0x76   :  { %1054 = vmatmul.mubr.bf16.gmra.mxu0 %v1138_v21 }
  0x77   :  { %1057 = vmatprep.mubr.bf16.mxu0 %v1139_v22 }
  0x7e   :  { %1058 = vmatmul.mubr.bf16.gmra.mxu0 %v1140_v23 }
 0x106   :  { %v1284_v32 = vpop.f32.mrf.mxu0 }
 0x107   :  { %v455_v40 = vmul.f32 %v1284_v32, %v1284_v32 }
 0x108   :  { %v1286_v33 = vpop.f32.mrf.mxu0 }
 0x109   :  { %v453_v36 = vmul.f32 %v1286_v33, %v1286_v33 }
 0x10a   :  { %v1288_v34 = vpop.f32.mrf.mxu0 }
 0x10b   :  { %v456_v44 = vmul.f32 %v1288_v34, %v1288_v34 }
 0x10c   :  { %v1290_v35 = vpop.f32.mrf.mxu0 }
 0x10d   :  { %v416_v37 = vadd.f32 %v1290_v35, %v1286_v33  ;;  %v454_v38 = vmul.f32 %v1290_v35, %v1290_v35 }
 0x10e   :  { %v1298_v39 = vpop.f32.mrf.mxu0 }
 0x10f   :  { %v417_v41 = vadd.f32 %v1284_v32, %v416_v37  ;;  %v485_v42 = vadd.f32 %v454_v38, %v453_v36  ;;  %v459_v56 = vmul.f32 %v1298_v39, %v1298_v39 }
 0x110   :  { %v1303_v43 = vpop.f32.mrf.mxu0 }
 0x111   :  { %v486_v45 = vadd.f32 %v485_v42, %v455_v40  ;;  %v418_v46 = vadd.f32 %v1288_v34, %v417_v41  ;;  %v457_v49 = vmul.f32 %v1303_v43, %v1303_v43 }
 0x112   :  { %v1308_v47 = vpop.f32.mrf.mxu0 }
 0x113   :  { %v419_v48 = vadd.f32 %v418_v46, %v1303_v43  ;;  %v487_v50 = vadd.f32 %v486_v45, %v456_v44  ;;  %v460_v60 = vmul.f32 %v1308_v47, %v1308_v47 }
 0x114   :  { %v1313_v51 = vpop.f32.mrf.mxu0 }
 0x115   :  { %v488_v52 = vadd.f32 %v487_v50, %v457_v49  ;;  %v420_v53 = vadd.f32 %v419_v48, %v1313_v51  ;;  %v458_v54 = vmul.f32 %v1313_v51, %v1313_v51 }
 0x116   :  { %v1318_v55 = vpop.f32.mrf.mxu0 }
 0x117   :  { %v421_v57 = vadd.f32 %v1298_v39, %v420_v53  ;;  %v489_v58 = vadd.f32 %v488_v52, %v458_v54  ;;  %v463_v8 = vmul.f32 %v1318_v55, %v1318_v55 }
 0x118   :  { %v1323_v59 = vpop.f32.mrf.mxu0 }
 0x119   :  { %v490_v61 = vadd.f32 %v489_v58, %v459_v56  ;;  %v422_v62 = vadd.f32 %v1308_v47, %v421_v57  ;;  %v461_v1 = vmul.f32 %v1323_v59, %v1323_v59 }
 0x11a   :  { %v1328_v63 = vpop.f32.mrf.mxu0 }
 0x11b   :  { %v423_v0 = vadd.f32 %v422_v62, %v1323_v59  ;;  %v491_v2 = vadd.f32 %v490_v61, %v460_v60  ;;  %v464_v12 = vmul.f32 %v1328_v63, %v1328_v63 }
 0x11c   :  { %v1333_v3 = vpop.f32.mrf.mxu0 }
 0x11d   :  { %v492_v4 = vadd.f32 %v491_v2, %v461_v1  ;;  %v424_v5 = vadd.f32 %v423_v0, %v1333_v3  ;;  %v462_v6 = vmul.f32 %v1333_v3, %v1333_v3 }
 0x11e   :  { %v1338_v7 = vpop.f32.mrf.mxu0 }
 0x11f   :  { %v425_v9 = vadd.f32 %v1318_v55, %v424_v5  ;;  %v493_v10 = vadd.f32 %v492_v4, %v462_v6  ;;  %v467_v24 = vmul.f32 %v1338_v7, %v1338_v7 }
 0x120   :  { %v1343_v11 = vpop.f32.mrf.mxu0 }
 0x121   :  { %v494_v13 = vadd.f32 %v493_v10, %v463_v8  ;;  %v426_v14 = vadd.f32 %v1328_v63, %v425_v9  ;;  %v465_v17 = vmul.f32 %v1343_v11, %v1343_v11 }
 0x122   :  { %v1348_v15 = vpop.f32.mrf.mxu0 }
 0x123   :  { %v427_v16 = vadd.f32 %v426_v14, %v1343_v11  ;;  %v495_v18 = vadd.f32 %v494_v13, %v464_v12  ;;  %v468_v28 = vmul.f32 %v1348_v15, %v1348_v15 }
 0x124   :  { %v1353_v19 = vpop.f32.mrf.mxu0 }
 0x125   :  { %v496_v20 = vadd.f32 %v495_v18, %v465_v17  ;;  %v428_v21 = vadd.f32 %v427_v16, %v1353_v19  ;;  %v466_v22 = vmul.f32 %v1353_v19, %v1353_v19 }
 0x126   :  { %v1358_v23 = vpop.f32.mrf.mxu0 }
 0x127   :  { %v429_v25 = vadd.f32 %v1338_v7, %v428_v21  ;;  %v497_v26 = vadd.f32 %v496_v20, %v466_v22  ;;  %v471_v46 = vmul.f32 %v1358_v23, %v1358_v23 }
 0x128   :  { %v1363_v27 = vpop.f32.mrf.mxu0 }
 0x129   :  { %v498_v29 = vadd.f32 %v497_v26, %v467_v24  ;;  %v430_v30 = vadd.f32 %v1348_v15, %v429_v25  ;;  %v469_v37 = vmul.f32 %v1363_v27, %v1363_v27 }
 0x12a   :  { %v1368_v31 = vpop.f32.mrf.mxu0 }
 0x12b   :  { %v431_v36 = vadd.f32 %v430_v30, %v1363_v27  ;;  %v499_v38 = vadd.f32 %v498_v29, %v468_v28  ;;  %v472_v52 = vmul.f32 %v1368_v31, %v1368_v31 }
 0x12c   :  { %v1373_v40 = vpop.f32.mrf.mxu0 }
 0x12d   :  { %v500_v41 = vadd.f32 %v499_v38, %v469_v37  ;;  %v432_v42 = vadd.f32 %v431_v36, %v1373_v40  ;;  %v470_v44 = vmul.f32 %v1373_v40, %v1373_v40 }
 0x12e   :  { %v1378_v45 = vpop.f32.mrf.mxu0 }
 0x12f   :  { %v433_v48 = vadd.f32 %v1358_v23, %v432_v42  ;;  %v501_v49 = vadd.f32 %v500_v41, %v470_v44  ;;  %v475_v4 = vmul.f32 %v1378_v45, %v1378_v45 }
 0x130   :  { %v1383_v50 = vpop.f32.mrf.mxu0 }
 0x131   :  { %v502_v53 = vadd.f32 %v501_v49, %v471_v46  ;;  %v434_v54 = vadd.f32 %v1368_v31, %v433_v48  ;;  %v473_v58 = vmul.f32 %v1383_v50, %v1383_v50 }
 0x132   :  { %v1388_v56 = vpop.f32.mrf.mxu0 }
 0x133   :  { %v435_v57 = vadd.f32 %v434_v54, %v1383_v50  ;;  %v503_v60 = vadd.f32 %v502_v53, %v472_v52  ;;  %v476_v9 = vmul.f32 %v1388_v56, %v1388_v56 }
 0x134   :  { %v1393_v61 = vpop.f32.mrf.mxu0 }
 0x135   :  { %v504_v62 = vadd.f32 %v503_v60, %v473_v58  ;;  %v436_v0 = vadd.f32 %v435_v57, %v1393_v61  ;;  %v474_v1 = vmul.f32 %v1393_v61, %v1393_v61 }
 0x136   :  { %v1398_v2 = vpop.f32.mrf.mxu0 }
 0x137   :  { %v437_v5 = vadd.f32 %v1378_v45, %v436_v0  ;;  %v505_v6 = vadd.f32 %v504_v62, %v474_v1  ;;  %v479_v25 = vmul.f32 %v1398_v2, %v1398_v2 }
 0x138   :  { %v1403_v8 = vpop.f32.mrf.mxu0 }
 0x139   :  { %v506_v10 = vadd.f32 %v505_v6, %v475_v4  ;;  %v438_v12 = vadd.f32 %v1388_v56, %v437_v5  ;;  %v477_v16 = vmul.f32 %v1403_v8, %v1403_v8 }
 0x13a   :  { %v1408_v13 = vpop.f32.mrf.mxu0 }
 0x13b   :  { %v439_v14 = vadd.f32 %v438_v12, %v1403_v8  ;;  %v507_v17 = vadd.f32 %v506_v10, %v476_v9  ;;  %v480_v30 = vmul.f32 %v1408_v13, %v1408_v13 }
 0x13c   :  { %v1413_v18 = vpop.f32.mrf.mxu0 }
 0x13d   :  { %v508_v20 = vadd.f32 %v507_v17, %v477_v16  ;;  %v440_v21 = vadd.f32 %v439_v14, %v1413_v18  ;;  %v478_v22 = vmul.f32 %v1413_v18, %v1413_v18 }
 0x13e   :  { %v1418_v24 = vpop.f32.mrf.mxu0 }
 0x13f   :  { %v441_v26 = vadd.f32 %v1398_v2, %v440_v21  ;;  %v509_v28 = vadd.f32 %v508_v20, %v478_v22  ;;  %v483_v53 = vmul.f32 %v1418_v24, %v1418_v24 }
 0x140   :  { %v1423_v29 = vpop.f32.mrf.mxu0 }
 0x141   :  { %v510_v36 = vadd.f32 %v509_v28, %v479_v25  ;;  %v442_v37 = vadd.f32 %v1408_v13, %v441_v26  ;;  %v481_v42 = vmul.f32 %v1423_v29, %v1423_v29 }
 0x142   :  { %v1428_v38 = vpop.f32.mrf.mxu0 }
 0x143   :  { %v443_v41 = vadd.f32 %v442_v37, %v1423_v29  ;;  %v511_v44 = vadd.f32 %v510_v36, %v480_v30  ;;  %v484_v58 = vmul.f32 %v1428_v38, %v1428_v38  ;;  %v527_v37 = vld [vmem:[%s1555_s2] sm:$0x1]  ;;  %s1242_s2 = smov [#allocation8]  }
 0x144   :  { %v404_v46 = vpop.f32.mrf.mxu0 }
 0x145   :  { %v512_v48 = vadd.f32 %v511_v44, %v481_v42  ;;  %v444_v49 = vadd.f32 %v443_v41, %v404_v46  ;;  %v482_v52 = vmul.f32 %v404_v46, %v404_v46  ;;  %v535_v41 = vlaneseq }
 0x147   :  { %v445_v54 = vadd.f32 %v1418_v24, %v444_v49  ;;  %v513_v57 = vadd.f32 %v512_v48, %v482_v52  ;;  %v536_v48 = vshrl.u32 %v535_v41, 7  ;;  %v531_v52 = vld [vmem:[%s1556_s3] sm:$0x1]  ;;  %s920_s3 = sshll.u32 %s1242_s2, 4  ;;  %s921_s3 = int_to_ptr.vmem [resolvable:$true] %s920_s3 }
 0x148   :  { %s1211_s11 = scalar_lea.vmem %s921_s3, 4096  ;;  %p1216_p2 = scmp.lt.s32.totalorder %s921_s3, %s921_s3 }
 0x149   :  { %v446_v60 = vadd.f32 %v1428_v38, %v445_v54  ;;  %v514_v62 = vadd.f32 %v513_v57, %v483_v53  ;;  %v537_v53 = vsub.s32 0, %v536_v48  ;;  %p1212_p1 = scmp.ne.s32.totalorder %s921_s3, %s1211_s11  ;;  %p1217_p3 = scmp.lt.s32.totalorder %s1211_s11, %s1211_s11 }
 0x14b   :  { %v447_v0 = vrot.slane %v446_v60, 4  ;;  %v515_v1 = vadd.f32 %v514_v62, %v484_v58  ;;  %p1218_p4 = por %p1217_p3, %p1216_p2 }
 0x14d   :  { %v448_v4 = vadd.f32 %v447_v0, %v446_v60  ;;  %v516_v5 = vrot.slane %v515_v1, 4  ;;  %p1219_p5 = pnand %p1218_p4, %p1212_p1 }
 0x14f   :  { %v449_v6 = vrot.slane %v448_v4, 2  ;;  %v517_v9 = vadd.f32 %v516_v5, %v515_v1 }
 0x151   :  { %v450_v10 = vadd.f32 %v449_v6, %v448_v4  ;;  %v518_v12 = vrot.slane %v517_v9, 2 }
 0x153   :  { %v451_v14 = vrot.slane %v450_v10, 1  ;;  %v519_v16 = vadd.f32 %v518_v12, %v517_v9 }
 0x155   :  { %v452_v17 = vadd.f32 %v451_v14, %v450_v10  ;;  %v520_v20 = vrot.slane %v519_v16, 1 }
 0x157   :  { %v521_v21 = vadd.f32 %v520_v20, %v519_v16  ;;  %v522_v22 = vmul.f32 0.00390625, %v452_v17 }
 0x159   :  { %v523_v25 = vmul.f32 0.00390625, %v521_v21  ;;  %v524_v26 = vmul.f32 %v522_v22, %v522_v22 }
 0x15b   :  { %v525_v28 = vsub.f32 %v523_v25, %v524_v26 }
 0x15d   :  { %v526_v30 = vmax.f32 %v525_v28, 0.0 }
 0x15f   :  { %v528_v36 = vadd.f32 1e-05, %v526_v30 }
 0x161   :  { %1149 = vrsqrt.f32 %v528_v36 }
 0x16e   :  { %v1150_v42 = vpop.eup %1149 }
 0x16f   :  { %v530_v44 = vmul.f32 %v1150_v42, %v527_v37 }
 0x171   :  { %v532_v49 = vmul.f32 %v530_v44, %v522_v22  ;;  %v1445_v57 = vrot.slane %v530_v44, %v537_v53 }
 0x173   :  { %v533_v54 = vsub.f32 %v531_v52, %v532_v49  ;;  %v542_v60 = vmul.f32 %v1284_v32, %v1445_v57  ;;  %v543_v62 = vmul.f32 %v1288_v34, %v1445_v57  ;;  %v544_v0 = vmul.f32 %v1445_v57, %v1303_v43 }
 0x174   :  { %v545_v1 = vmul.f32 %v1445_v57, %v1313_v51  ;;  %v540_v6 = vmul.f32 %v1445_v57, %v1286_v33  ;;  %v541_v9 = vmul.f32 %v1445_v57, %v1290_v35  ;;  %v569_v51 = vmul.f32 %v1445_v57, %v404_v46 }
 0x175   :  { %v1447_v58 = vrot.slane %v533_v54, %v537_v53  ;;  %v546_v33 = vmul.f32 %v1298_v39, %v1445_v57  ;;  %v547_v35 = vmul.f32 %v1308_v47, %v1445_v57  ;;  %v548_v22 = vmul.f32 %v1445_v57, %v1323_v59 }
 0x176   :  { %v549_v46 = vmul.f32 %v1445_v57, %v1333_v3  ;;  %v568_v28 = vmul.f32 %v1445_v57, %v1423_v29  ;;  %v570_v36 = vmul.f32 %v1418_v24, %v1445_v57  ;;  %v571_v39 = vmul.f32 %v1428_v38, %v1445_v57 }
 0x177   :  { %v580_v4 = vadd.f32 %v1447_v58, %v542_v60  ;;  %v581_v5 = vadd.f32 %v1447_v58, %v543_v62  ;;  %v582_v32 = vadd.f32 %v1447_v58, %v544_v0  ;;  %v583_v34 = vadd.f32 %v1447_v58, %v545_v1 }
 0x178   :  { %v578_v10 = vadd.f32 %v1447_v58, %v540_v6  ;;  %v579_v43 = vadd.f32 %v1447_v58, %v541_v9  ;;  %v607_v26 = vadd.f32 %v1447_v58, %v569_v51  ;;  %v584_v47 = vadd.f32 %v1447_v58, %v546_v33 }
 0x179   :  { %v612_v12 = vmax.f32 %v580_v4, 0.0  ;;  %v613_v14 = vmax.f32 %v581_v5, 0.0  ;;  %v614_v20 = vmax.f32 %v582_v32, 0.0  ;;  %v615_v21 = vmax.f32 %v583_v34, 0.0 }
 0x17a   :  { %v610_v16 = vmax.f32 %v578_v10, 0.0  ;;  %v611_v17 = vmax.f32 %v579_v43, 0.0  ;;  %v585_v59 = vadd.f32 %v1447_v58, %v547_v35  ;;  %v586_v37 = vadd.f32 %v1447_v58, %v548_v22 }
 0x17b   :  { %v643_v25 = vpack.c.bf16 %v613_v14, %v612_v12  ;;  %v587_v41 = vadd.f32 %v1447_v58, %v549_v46  ;;  %v606_v3 = vadd.f32 %v1447_v58, %v568_v28  ;;  %v644_v42 = vpack.c.bf16 %v615_v21, %v614_v20 }
 0x17c   :  { %v642_v30 = vpack.c.bf16 %v611_v17, %v610_v16  ;;  %v608_v29 = vadd.f32 %v1447_v58, %v570_v36  ;;  %v609_v44 = vadd.f32 %v1447_v58, %v571_v39  ;;  %v639_v24 = vmax.f32 %v607_v26, 0.0 }
 0x17d   :  { %v616_v38 = vmax.f32 %v584_v47, 0.0  ;;  %v617_v48 = vmax.f32 %v585_v59, 0.0  ;;  %v618_v49 = vmax.f32 %v586_v37, 0.0  ;;  %v619_v52 = vmax.f32 %v587_v41, 0.0 }
 0x17e   :  { %1077 = vmatprep.mubr.bf16.mxu1 %v642_v30  ;;  %v638_v53 = vmax.f32 %v606_v3, 0.0  ;;  %v550_v54 = vmul.f32 %v1318_v55, %v1445_v57  ;;  %v551_v60 = vmul.f32 %v1328_v63, %v1445_v57  ;;  %v640_v62 = vmax.f32 %v608_v29, 0.0 }
 0x17f   :  { %1078 = vmatmul.mubr.bf16.vlgmr.msra.gmra.mxu1 %v643_v25  ;;  %v641_v0 = vmax.f32 %v609_v44, 0.0  ;;  %v552_v1 = vmul.f32 %v1445_v57, %v1343_v11  ;;  %v553_v4 = vmul.f32 %v1445_v57, %v1353_v19  ;;  %v645_v32 = vpack.c.bf16 %v617_v48, %v616_v38 }
 0x180   :  { %1081 = vmatprep.mubr.bf16.mxu1 %v644_v42  ;;  %v1498_v5 = vpack.c.bf16 %v639_v24, %v638_v53  ;;  %v588_v6 = vadd.f32 %v1447_v58, %v550_v54  ;;  %v589_v9 = vadd.f32 %v1447_v58, %v551_v60  ;;  %v646_v10 = vpack.c.bf16 %v619_v52, %v618_v49 }
 0x181   :  { %v1502_v34 = vpack.c.bf16 %v641_v0, %v640_v62  ;;  %v590_v55 = vadd.f32 %v1447_v58, %v552_v1  ;;  %v591_v63 = vadd.f32 %v1447_v58, %v553_v4  ;;  %v554_v51 = vmul.f32 %v1338_v7, %v1445_v57 }
 0x182   :  { %v620_v11 = vmax.f32 %v588_v6, 0.0  ;;  %v621_v43 = vmax.f32 %v589_v9, 0.0  ;;  %v555_v14 = vmul.f32 %v1348_v15, %v1445_v57  ;;  %v556_v16 = vmul.f32 %v1445_v57, %v1363_v27 }
 0x183   :  { %v622_v12 = vmax.f32 %v590_v55, 0.0  ;;  %v623_v19 = vmax.f32 %v591_v63, 0.0  ;;  %v557_v17 = vmul.f32 %v1445_v57, %v1373_v40  ;;  %v592_v20 = vadd.f32 %v1447_v58, %v554_v51 }
 0x184   :  { %v593_v21 = vadd.f32 %v1447_v58, %v555_v14  ;;  %v647_v33 = vpack.c.bf16 %v621_v43, %v620_v11  ;;  %v594_v35 = vadd.f32 %v1447_v58, %v556_v16  ;;  %v558_v27 = vmul.f32 %v1358_v23, %v1445_v57 }
 0x185   :  { %v595_v22 = vadd.f32 %v1447_v58, %v557_v17  ;;  %v648_v25 = vpack.c.bf16 %v623_v19, %v622_v12  ;;  %v624_v7 = vmax.f32 %v592_v20, 0.0  ;;  %v559_v40 = vmul.f32 %v1368_v31, %v1445_v57 }
 0x186   :  { %v625_v15 = vmax.f32 %v593_v21, 0.0  ;;  %v626_v26 = vmax.f32 %v594_v35, 0.0  ;;  %v560_v28 = vmul.f32 %v1445_v57, %v1383_v50  ;;  %v561_v30 = vmul.f32 %v1445_v57, %v1393_v61 }
 0x187   :  { %1082 = vmatmul.mubr.bf16.gmra.mxu1 %v645_v32  ;;  %v627_v46 = vmax.f32 %v595_v22, 0.0  ;;  %v596_v36 = vadd.f32 %v1447_v58, %v558_v27  ;;  %v597_v39 = vadd.f32 %v1447_v58, %v559_v40  ;;  %v562_v50 = vmul.f32 %v1378_v45, %v1445_v57 }
 0x188   :  { %1085 = vmatprep.mubr.bf16.mxu1 %v646_v10  ;;  %v649_v47 = vpack.c.bf16 %v625_v15, %v624_v7  ;;  %v598_v59 = vadd.f32 %v1447_v58, %v560_v28  ;;  %v599_v37 = vadd.f32 %v1447_v58, %v561_v30  ;;  %v563_v61 = vmul.f32 %v1388_v56, %v1445_v57 }
 0x189   :  { %v650_v41 = vpack.c.bf16 %v627_v46, %v626_v26  ;;  %v628_v23 = vmax.f32 %v596_v36, 0.0  ;;  %v629_v31 = vmax.f32 %v597_v39, 0.0  ;;  %v564_v29 = vmul.f32 %v1445_v57, %v1403_v8 }
 0x18a   :  { %v630_v3 = vmax.f32 %v598_v59, 0.0  ;;  %v631_v42 = vmax.f32 %v599_v37, 0.0  ;;  %v565_v44 = vmul.f32 %v1445_v57, %v1413_v18  ;;  %v600_v24 = vadd.f32 %v1447_v58, %v562_v50 }
 0x18b   :  { %v601_v38 = vadd.f32 %v1447_v58, %v563_v61  ;;  %v651_v48 = vpack.c.bf16 %v629_v31, %v628_v23  ;;  %v602_v49 = vadd.f32 %v1447_v58, %v564_v29  ;;  %v566_v8 = vmul.f32 %v1398_v2, %v1445_v57 }
 0x18c   :  { %v603_v52 = vadd.f32 %v1447_v58, %v565_v44  ;;  %v652_v53 = vpack.c.bf16 %v631_v42, %v630_v3  ;;  %v632_v45 = vmax.f32 %v600_v24, 0.0  ;;  %v567_v18 = vmul.f32 %v1408_v13, %v1445_v57 }
 0x18d   :  { %v633_v56 = vmax.f32 %v601_v38, 0.0  ;;  %v634_v54 = vmax.f32 %v602_v49, 0.0  ;;  %v604_v62 = vadd.f32 %v1447_v58, %v566_v8 }
 0x18e   :  { %v635_v60 = vmax.f32 %v603_v52, 0.0  ;;  %v605_v0 = vadd.f32 %v1447_v58, %v567_v18 }
 0x18f   :  { %1086 = vmatmul.mubr.bf16.gmra.mxu1 %v647_v33  ;;  %v653_v1 = vpack.c.bf16 %v633_v56, %v632_v45  ;;  %v636_v6 = vmax.f32 %v604_v62, 0.0 }
 0x190   :  { %1089 = vmatprep.mubr.bf16.mxu1 %v648_v25  ;;  %v654_v4 = vpack.c.bf16 %v635_v60, %v634_v54  ;;  %v637_v9 = vmax.f32 %v605_v0, 0.0 }
 0x192   :  { %v655_v32 = vpack.c.bf16 %v637_v9, %v636_v6 }
 0x197   :  { %1090 = vmatmul.mubr.bf16.gmra.mxu1 %v649_v47 }
 0x198   :  { %1093 = vmatprep.mubr.bf16.mxu1 %v650_v41 }
 0x19f   :  { %1094 = vmatmul.mubr.bf16.gmra.mxu1 %v651_v48 }
 0x1a0   :  { %1097 = vmatprep.mubr.bf16.mxu1 %v652_v53 }
 0x1a7   :  { %1098 = vmatmul.mubr.bf16.gmra.mxu1 %v653_v1 }
 0x1a8   :  { %1101 = vmatprep.mubr.bf16.mxu1 %v654_v4 }
 0x1af   :  { %1102 = vmatmul.mubr.bf16.gmra.mxu1 %v655_v32 }
 0x1b0   :  { %1105 = vmatprep.mubr.bf16.mxu1 %v1498_v5 }
 0x1b7   :  { %1106 = vmatmul.mubr.bf16.gmra.mxu1 %v1502_v34 }
 0x23f   :  { %v1079_v2 = vpop.f32.mrf.mxu1 }
 0x240   :  { %885 = vst [vmem:[#allocation8 + $0x10] sm:$0xff] %v1079_v2 }
 0x241   :  { %v756_v55 = vpop.f32.mrf.mxu1 }
 0x242   :  { %883 = vst [vmem:[#allocation8] sm:$0xff] %v756_v55 }
 0x243   :  { %v1080_v13 = vpop.f32.mrf.mxu1 }
 0x244   :  { %886 = vst [vmem:[#allocation8 + $0x18] sm:$0xff] %v1080_v13 }
 0x245   :  { %v759_v57 = vpop.f32.mrf.mxu1 }
 0x246   :  { %884 = vst [vmem:[#allocation8 + $0x8] sm:$0xff] %v759_v57 }
 0x247   :  { %v1083_v58 = vpop.f32.mrf.mxu1 }
 0x248   :  { %889 = vst [vmem:[#allocation8 + $0x30] sm:$0xff] %v1083_v58 }
 0x249   :  { %v772_v63 = vpop.f32.mrf.mxu1 }
 0x24a   :  { %887 = vst [vmem:[#allocation8 + $0x20] sm:$0xff] %v772_v63 }
 0x24b   :  { %v1084_v10 = vpop.f32.mrf.mxu1 }
 0x24c   :  { %890 = vst [vmem:[#allocation8 + $0x38] sm:$0xff] %v1084_v10 }
 0x24d   :  { %v775_v11 = vpop.f32.mrf.mxu1 }
 0x24e   :  { %888 = vst [vmem:[#allocation8 + $0x28] sm:$0xff] %v775_v11 }
 0x24f   :  { %v1087_v43 = vpop.f32.mrf.mxu1 }
 0x250   :  { %893 = vst [vmem:[#allocation8 + $0x50] sm:$0xff] %v1087_v43 }
 0x251   :  { %v788_v5 = vpop.f32.mrf.mxu1 }
 0x252   :  { %891 = vst [vmem:[#allocation8 + $0x40] sm:$0xff] %v788_v5 }
 0x253   :  { %v1088_v34 = vpop.f32.mrf.mxu1 }
 0x254   :  { %894 = vst [vmem:[#allocation8 + $0x58] sm:$0xff] %v1088_v34 }
 0x255   :  { %v791_v12 = vpop.f32.mrf.mxu1 }
 0x256   :  { %892 = vst [vmem:[#allocation8 + $0x48] sm:$0xff] %v791_v12 }
 0x257   :  { %v1091_v19 = vpop.f32.mrf.mxu1 }
 0x258   :  { %897 = vst [vmem:[#allocation8 + $0x70] sm:$0xff] %v1091_v19 }
 0x259   :  { %v804_v51 = vpop.f32.mrf.mxu1 }
 0x25a   :  { %895 = vst [vmem:[#allocation8 + $0x60] sm:$0xff] %v804_v51 }
 0x25b   :  { %v1092_v14 = vpop.f32.mrf.mxu1 }
 0x25c   :  { %898 = vst [vmem:[#allocation8 + $0x78] sm:$0xff] %v1092_v14 }
 0x25d   :  { %v807_v16 = vpop.f32.mrf.mxu1 }
 0x25e   :  { %896 = vst [vmem:[#allocation8 + $0x68] sm:$0xff] %v807_v16 }
 0x25f   :  { %v1095_v17 = vpop.f32.mrf.mxu1 }
 0x260   :  { %901 = vst [vmem:[#allocation8 + $0x90] sm:$0xff] %v1095_v17 }
 0x261   :  { %v820_v20 = vpop.f32.mrf.mxu1 }
 0x262   :  { %899 = vst [vmem:[#allocation8 + $0x80] sm:$0xff] %v820_v20 }
 0x263   :  { %v1096_v21 = vpop.f32.mrf.mxu1 }
 0x264   :  { %902 = vst [vmem:[#allocation8 + $0x98] sm:$0xff] %v1096_v21 }
 0x265   :  { %v823_v33 = vpop.f32.mrf.mxu1 }
 0x266   :  { %900 = vst [vmem:[#allocation8 + $0x88] sm:$0xff] %v823_v33 }
 0x267   :  { %v1099_v35 = vpop.f32.mrf.mxu1 }
 0x268   :  { %905 = vst [vmem:[#allocation8 + $0xb0] sm:$0xff] %v1099_v35 }
 0x269   :  { %v836_v22 = vpop.f32.mrf.mxu1 }
 0x26a   :  { %903 = vst [vmem:[#allocation8 + $0xa0] sm:$0xff] %v836_v22 }
 0x26b   :  { %v1100_v25 = vpop.f32.mrf.mxu1 }
 0x26c   :  { %906 = vst [vmem:[#allocation8 + $0xb8] sm:$0xff] %v1100_v25 }
 0x26d   :  { %v839_v7 = vpop.f32.mrf.mxu1 }
 0x26e   :  { %904 = vst [vmem:[#allocation8 + $0xa8] sm:$0xff] %v839_v7 }
 0x26f   :  { %v1103_v15 = vpop.f32.mrf.mxu1 }
 0x270   :  { %909 = vst [vmem:[#allocation8 + $0xd0] sm:$0xff] %v1103_v15 }
 0x271   :  { %v852_v26 = vpop.f32.mrf.mxu1 }
 0x272   :  { %907 = vst [vmem:[#allocation8 + $0xc0] sm:$0xff] %v852_v26 }
 0x273   :  { %v1104_v46 = vpop.f32.mrf.mxu1 }
 0x274   :  { %910 = vst [vmem:[#allocation8 + $0xd8] sm:$0xff] %v1104_v46 }
 0x275   :  { %v855_v27 = vpop.f32.mrf.mxu1 }
 0x276   :  { %908 = vst [vmem:[#allocation8 + $0xc8] sm:$0xff] %v855_v27 }
 0x277   :  { %v1107_v40 = vpop.f32.mrf.mxu1 }
 0x278   :  { %913 = vst [vmem:[#allocation8 + $0xf0] sm:$0xff] %v1107_v40 }
 0x279   :  { %v868_v28 = vpop.f32.mrf.mxu1 }
 0x27a   :  { %911 = vst [vmem:[#allocation8 + $0xe0] sm:$0xff] %v868_v28 }
 0x27b   :  { %v1108_v30 = vpop.f32.mrf.mxu1 }
 0x27c   :  { %914 = vst [vmem:[#allocation8 + $0xf8] sm:$0xff] %v1108_v30 }
 0x27d   :  { %v871_v36 = vpop.f32.mrf.mxu1 }
 0x27e   :  { %912 = vst [vmem:[#allocation8 + $0xe8] sm:$0xff] %v871_v36 }
 0x27f   :  { %1222 = shalt.err (!%p1219_p5)
}
 0x280   :  { %s1243_s12 = smov 128   ;;  %s1244_s13 = smov 8  }
 0x281   :  { %926 = dma.vmem_to_hbm [thread:$0]  %s921_s3, 4096, %s1558_s5, [#allocation4], %s1243_s12, %s1243_s12, %s1244_s13  }
 0x282   :  { %1235 = dma.done.wait [#allocation4], 4096  }
 0x283   :  { %1236 = vsyncadd [#allocation4], 4294963200 }
 0x284   :  { %930 = vsyncpa [#allocation3], 1 }
 0x285   :  { %931 = vsyncpa [#allocation6], 1 }
 0x286   :  { %932 = vsyncpa [#allocation4], 1 }

</bundles_post_ra>
